<compile_context>
chip_gen: v7x
topology: tpu7x:2x2x1
jax: 0.10.0
libtpu: 0.0.40
codegen_flags: <defaults>
</compile_context>

<pallas_src>
import functools

import jax
import jax.numpy as jnp
from jax.experimental import pallas as pl
from jax.experimental.pallas import tpu as pltpu

LANE = 128  # TPU lane width; all matmul operands are padded to this.


# ----------------------------- Pallas kernel --------------------------------
def fused_net_kernel(p_ref, w1_ref, w2_ref, o_ref):
    """Whole network as two dense, lane-aligned 2D MXU matmuls.

    p_ref : (TM, 128)   im2col patches, ones column at lane S*K (bias fold),
                        zero lanes after.
    w1_ref: (128, 128)  block-diag conv weight + conv-bias row + 1.0
                        passthrough lane; rows/cols past the logical size = 0.
    w2_ref: (128, 128)  linear weight in final (Cout, Hout, OUT_F) lane order,
                        last logical row = linear bias; padding = 0.
    o_ref : (TM, 128)   final layout in the first Cout*Hout*OUT_F lanes.
    """
    a = jnp.dot(p_ref[...], w1_ref[...], preferred_element_type=jnp.float32)
    a = jnp.maximum(a, 0.0)            # ReLU; bias-passthrough lane stays 1.0
    a = a.astype(w2_ref.dtype)         # bf16 MXU feed on v6e/v7x if selected
    o_ref[...] = jnp.dot(a, w2_ref[...],
                         preferred_element_type=jnp.float32).astype(o_ref.dtype)


# --------------------------- one-time weight build ---------------------------
def build_fused_weights(conv_w, conv_b, lin_w, lin_b, hout, wout,
                        *, operand_dtype=jnp.float32):
    """Precompute the two padded 128x128 matmul operands (once per model)."""
    Cout, Cin, KH, KW = conv_w.shape
    OUT_F = lin_w.shape[0]
    K = Cin * KH * KW
    S = hout * wout
    SK, SC, N = S * K, S * Cout, Cout * hout * OUT_F
    assert SK + 1 <= LANE and SC + 1 <= LANE and N <= LANE
    # TODO(synk): for spatial sizes beyond ~6x6, drop this S^2 block-diagonal
    # w1 (it is >96% zeros) and run the conv as a dense (B*S,K)x(K,Cout) matmul
    # plus the Linear over (B*Cout*Hout, Wout) instead.

    # Matmul 1: conv at all S output positions (block-diag over S), conv bias
    # via the ones column, plus a passthrough lane that survives ReLU as 1.0.
    wc_t = conv_w.reshape(Cout, K).T.astype(jnp.float32)                # (K, Cout)
    w1 = jnp.zeros((LANE, LANE), jnp.float32)
    w1 = w1.at[:SK, :SC].set(jnp.kron(jnp.eye(S, dtype=jnp.float32), wc_t))
    w1 = w1.at[SK, :SC].set(jnp.tile(conv_b.astype(jnp.float32), S))
    w1 = w1.at[SK, SC].set(1.0)

    # Matmul 2: Linear over the conv-W axis, output lanes already ordered
    # (Cout, Hout, OUT_F) = final PyTorch layout; last logical row = bias.
    wl_t = lin_w.T.astype(jnp.float32)                                   # (Wout, OUT_F)
    eye_h = jnp.eye(hout, dtype=jnp.float32)
    eye_c = jnp.eye(Cout, dtype=jnp.float32)
    blocks = (eye_h[:, None, None, None, :, None] *
              eye_c[None, None, :, :, None, None] *
              wl_t[None, :, None, None, None, :])   # (Hout,Wout,Cout, Cout,Hout,OUT_F)
    w2 = jnp.zeros((LANE, LANE), jnp.float32)
    w2 = w2.at[:SC, :N].set(blocks.reshape(SC, N))
    w2 = w2.at[SC, :N].set(jnp.tile(lin_b.astype(jnp.float32), Cout * hout))

    return w1.astype(operand_dtype), w2.astype(operand_dtype)


# ------------------------------- glue / wrapper ------------------------------
def _extract_patches(x, kh, kw, stride):
    """im2col in one HLO. Returns (B, Hout*Wout*Cin*kh*kw), lanes (ho,wo,cin,kh,kw)."""
    B, Cin, H, W = x.shape
    hout = (H - kh) // stride + 1
    wout = (W - kw) // stride + 1
    p = jax.lax.conv_general_dilated_patches(
        x, filter_shape=(kh, kw), window_strides=(stride, stride),
        padding="VALID", dimension_numbers=("NCHW", "OIHW", "NCHW"))
    p = p.transpose(0, 2, 3, 1).reshape(B, hout * wout * Cin * kh * kw)
    return p, hout, wout


@functools.partial(
    jax.jit,
    static_argnames=("kh", "kw", "stride", "cout", "out_f", "operand_dtype"))
def neural_network_forward(x, w1, w2, *, kh, kw, stride, cout, out_f,
                           operand_dtype=jnp.float32):
    """Equivalent of NeuralNetwork.forward; w1/w2 come from build_fused_weights."""
    B = x.shape[0]
    x = x.astype(jnp.float32)
    p, hout, wout = _extract_patches(x, kh, kw, stride)
    SK = p.shape[1]
    N = cout * hout * out_f

    # Fold the ones (bias) column and the zero lane-padding to 128 into ONE
    # concatenate: tail = [1, 0, 0, ...].
    tail = jnp.zeros((LANE - SK,), jnp.float32).at[0].set(1.0)
    p_pad = jnp.concatenate(
        [p, jnp.broadcast_to(tail, (B, LANE - SK))], axis=1).astype(operand_dtype)

    # Batch row-block grid.  Tiny batches pad to one 16-row block (valid for
    # both f32 and bf16 sublane tiling); large batches use 512-row blocks
    # (~85% of HBM roofline per measured tiling data).
    TM = 512 if B >= 512 else ((B + 15) // 16) * 16
    B_pad = pl.cdiv(B, TM) * TM
    if B_pad != B:
        p_pad = jnp.pad(p_pad, ((0, B_pad - B), (0, 0)))

    out = pl.pallas_call(
        fused_net_kernel,
        out_shape=jax.ShapeDtypeStruct((B_pad, LANE), jnp.float32),
        grid=(B_pad // TM,),
        in_specs=[
            pl.BlockSpec((TM, LANE), lambda i: (i, 0)),     # batch-tiled patches
            pl.BlockSpec((LANE, LANE), lambda i: (0, 0)),   # VMEM-resident weights
            pl.BlockSpec((LANE, LANE), lambda i: (0, 0)),
        ],
        out_specs=pl.BlockSpec((TM, LANE), lambda i: (i, 0)),
        compiler_params=pltpu.CompilerParams(
            # Batch axis is independent -> shards across both TCs on v7x.
            # (VMEM use here is well under the 32 MiB scoped default; re-derive
            #  TM / raise vmem_limit_bytes only if tiles grow toward v7x's
            #  64 MiB physical VMEM.)
            dimension_semantics=("parallel",)),
    )(p_pad, w1, w2)

    # Lanes already ordered (Cout, Hout, OUT_F): slice padding, free reshape.
    return out[:B, :N].reshape(B, cout, hout, out_f)


def reference_forward(x, conv_w, conv_b, lin_w, lin_b, *, stride=2):
    """Pure-JAX reference: Conv2d + ReLU + Linear (Linear acts on last dim = Wout)."""
    conv = jax.lax.conv_general_dilated(
        x, conv_w, window_strides=(stride, stride), padding="VALID",
        dimension_numbers=("NCHW", "OIHW", "NCHW"))
    conv = conv + conv_b[None, :, None, None]
    act = jnp.maximum(conv, 0.0)
    return jnp.einsum("bchw,jw->bchj", act, lin_w) + lin_b


# ----------------------------------- main ------------------------------------
if __name__ == "__main__":
    key = jax.random.PRNGKey(0)
    k_x, k_wc, k_bc, k_wl, k_bl = jax.random.split(key, 5)

    B, Cin, H, W = 2, 3, 6, 6            # H=W=6 -> conv out spatial 2x2 so Linear(2,6) applies
    Cout, KH, KW = 2, 3, 3
    OUT_F = 6
    stride = 2

    x = jax.random.normal(k_x, (B, Cin, H, W), jnp.float32)
    conv_w = jax.random.normal(k_wc, (Cout, Cin, KH, KW), jnp.float32) * 0.2
    conv_b = jax.random.normal(k_bc, (Cout,), jnp.float32) * 0.1
    lin_w = jax.random.normal(k_wl, (OUT_F, 2), jnp.float32) * 0.3
    lin_b = jax.random.normal(k_bl, (OUT_F,), jnp.float32) * 0.1

    hout = (H - KH) // stride + 1
    wout = (W - KW) // stride + 1

    # One-time (model-init) construction of the fused, padded matmul operands.
    # On v6e/v7x pass operand_dtype=jnp.bfloat16 here and in the forward call
    # (and loosen the tolerance); keep f32 on v5e.
    w1, w2 = build_fused_weights(conv_w, conv_b, lin_w, lin_b, hout, wout)

    out = neural_network_forward(x, w1, w2, kh=KH, kw=KW, stride=stride,
                                 cout=Cout, out_f=OUT_F)
    out = jax.block_until_ready(out)

    ref = reference_forward(x, conv_w, conv_b, lin_w, lin_b, stride=stride)
    assert out.shape == (B, Cout, hout, OUT_F), out.shape
    assert jnp.allclose(out, ref, atol=1e-4, rtol=1e-4), "mismatch vs reference"

    print("KERNEL_OK")
</pallas_src>

<mosaic_0001>
module attributes {stable_mosaic.version = 11 : i64} {
  func.func @fused_net_kernel(%arg0: i32, %arg1: memref<16x128xf32, #tpu.memory_space<vmem>>, %arg2: memref<128x128xf32, #tpu.memory_space<vmem>>, %arg3: memref<128x128xf32, #tpu.memory_space<vmem>>, %arg4: memref<16x128xf32, #tpu.memory_space<vmem>>) attributes {dimension_semantics = [#tpu.dimension_semantics<parallel>], iteration_bounds = array<i64: 1>, scalar_prefetch = 0 : i64, scratch_operands = 0 : i64, tpu.core_type = #tpu.core_type<tc>, window_params = [{transform_indices = @transform_0, window_bounds = array<i64: 16, 128>}, {pipeline_mode = #tpu.pipeline_mode<synchronous>, transform_indices = @transform_1, window_bounds = array<i64: 128, 128>}, {pipeline_mode = #tpu.pipeline_mode<synchronous>, transform_indices = @transform_2, window_bounds = array<i64: 128, 128>}, {transform_indices = @transform_3, window_bounds = array<i64: 16, 128>}]} {
    %c0 = arith.constant 0 : index
    %c0_0 = arith.constant 0 : index
    %0 = vector.load %arg1[%c0, %c0_0] : memref<16x128xf32, #tpu.memory_space<vmem>>, vector<16x128xf32>
    %c0_1 = arith.constant 0 : index
    %c0_2 = arith.constant 0 : index
    %1 = vector.load %arg2[%c0_1, %c0_2] : memref<128x128xf32, #tpu.memory_space<vmem>>, vector<128x128xf32>
    %cst = arith.constant dense<0.000000e+00> : vector<16x128xf32>
    %2 = tpu.matmul %0, %1, %cst {dimension_numbers = #tpu.dot_dimension_numbers<[1], [0], [0], [1], [0, 0, 1, 1], [], []>} : vector<16x128xf32>, vector<128x128xf32>, vector<16x128xf32> -> vector<16x128xf32>
    %cst_3 = arith.constant 0.000000e+00 : f32
    %3 = vector.broadcast %cst_3 : f32 to vector<16x128xf32>
    %4 = arith.maximumf %2, %3 : vector<16x128xf32>
    %c0_4 = arith.constant 0 : index
    %c0_5 = arith.constant 0 : index
    %5 = vector.load %arg3[%c0_4, %c0_5] : memref<128x128xf32, #tpu.memory_space<vmem>>, vector<128x128xf32>
    %cst_6 = arith.constant dense<0.000000e+00> : vector<16x128xf32>
    %6 = tpu.matmul %4, %5, %cst_6 {dimension_numbers = #tpu.dot_dimension_numbers<[1], [0], [0], [1], [0, 0, 1, 1], [], []>} : vector<16x128xf32>, vector<128x128xf32>, vector<16x128xf32> -> vector<16x128xf32>
    %c0_7 = arith.constant 0 : index
    %c0_8 = arith.constant 0 : index
    %7 = vector.load %arg4[%c0_7, %c0_8] : memref<16x128xf32, #tpu.memory_space<vmem>>, vector<16x128xf32>
    tpu.vector_store %arg4[%c0_7, %c0_8], %6 {strides = array<i32>} : memref<16x128xf32, #tpu.memory_space<vmem>>, vector<16x128xf32>,
    return
  }
  func.func @transform_0(%arg0: i32) -> (i32, i32) {
    %c0_i32 = arith.constant 0 : i32
    %c0_i32_0 = arith.constant 0 : i32
    return %arg0, %c0_i32 : i32, i32
  }
  func.func @transform_1(%arg0: i32) -> (i32, i32) {
    %c0_i32 = arith.constant 0 : i32
    %c0_i32_0 = arith.constant 0 : i32
    %c0_i32_1 = arith.constant 0 : i32
    return %c0_i32, %c0_i32_0 : i32, i32
  }
  func.func @transform_2(%arg0: i32) -> (i32, i32) {
    %c0_i32 = arith.constant 0 : i32
    %c0_i32_0 = arith.constant 0 : i32
    %c0_i32_1 = arith.constant 0 : i32
    return %c0_i32, %c0_i32_0 : i32, i32
  }
  func.func @transform_3(%arg0: i32) -> (i32, i32) {
    %c0_i32 = arith.constant 0 : i32
    %c0_i32_0 = arith.constant 0 : i32
    return %arg0, %c0_i32 : i32, i32
  }
}

</mosaic_0001>

<bundles_post_ra>
// kernel: neural_network_forward.1
= control target key start
LH: loop header
LB: loop body
LE: loop exit
PB: predicated region body
PF: predicated region fallthrough
CT: control target
= control target key end

     0   :  { %s504_s1 = inlined_call_operand.vmem [shape: f32[128,128], index: 1, kind: input, shape index: {}]   ;;  %s505_s0 = inlined_call_operand.vmem [shape: f32[16,128], index: 0, kind: input, shape index: {}]   ;;  %s506_s2 = inlined_call_operand.vmem [shape: f32[128,128], index: 2, kind: input, shape index: {}]   ;;  %s507_s3 = inlined_call_operand.vmem [shape: f32[16,128], index: 3, kind: output, shape index: {}]  }
   0x1   :  { %v16_v0 = vld [vmem:[%s504_s1] sm:$0xff]  ;;  %v17_v1 = vld [vmem:[%s504_s1 + $0x8] sm:$0xff]  ;;  %v18_v2 = vld [vmem:[%s504_s1 + $0x10] sm:$0xff] }
   0x2   :  { %v312_v3 = vpack.c.bf16 %v17_v1, %v16_v0  ;;  %v19_v4 = vld [vmem:[%s504_s1 + $0x18] sm:$0xff]  ;;  %v20_v6 = vld [vmem:[%s504_s1 + $0x20] sm:$0xff]  ;;  %v21_v7 = vld [vmem:[%s504_s1 + $0x28] sm:$0xff] }
   0x3   :  { %v316_v5 = vpack.c.bf16 %v19_v4, %v18_v2  ;;  %v320_v8 = vpack.c.bf16 %v21_v7, %v20_v6  ;;  %v22_v9 = vld [vmem:[%s504_s1 + $0x30] sm:$0xff]  ;;  %v23_v10 = vld [vmem:[%s504_s1 + $0x38] sm:$0xff]  ;;  %v14_v11 = vld [vmem:[%s505_s0] sm:$0xff] }
   0x4   :  { %313 = vmatprep.subr.bf16.mxu0 %v312_v3  ;;  %274 = vmatprep.mubr.f32.mxu0 %v14_v11  ;;  %v109_v12 = vld [vmem:[%s506_s2] sm:$0xff]  ;;  %v110_v13 = vld [vmem:[%s506_s2 + $0x8] sm:$0xff]  ;;  %v111_v14 = vld [vmem:[%s506_s2 + $0x10] sm:$0xff]  ;;  %v324_v20 = vpack.c.bf16 %v23_v10, %v22_v9 }
   0x5   :  { %315 = vmatpush3.bf16.msra.mxu0 %v312_v3  ;;  %v344_v15 = vpack.c.bf16 %v110_v13, %v109_v12  ;;  %v112_v16 = vld [vmem:[%s506_s2 + $0x18] sm:$0xff]  ;;  %v113_v18 = vld [vmem:[%s506_s2 + $0x20] sm:$0xff]  ;;  %v114_v19 = vld [vmem:[%s506_s2 + $0x28] sm:$0xff] }
   0x6   :  { %317 = vmatprep.subr.bf16.mxu0 %v316_v5  ;;  %v348_v17 = vpack.c.bf16 %v112_v16, %v111_v14  ;;  %v24_v21 = vld [vmem:[%s504_s1 + $0x40] sm:$0xff]  ;;  %v25_v22 = vld [vmem:[%s504_s1 + $0x48] sm:$0xff]  ;;  %v352_v23 = vpack.c.bf16 %v114_v19, %v113_v18  ;;  %v115_v24 = vld [vmem:[%s506_s2 + $0x30] sm:$0xff] }
   0x7   :  { %345 = vmatprep.subr.bf16.mxu1 %v344_v15  ;;  %v116_v25 = vld [vmem:[%s506_s2 + $0x38] sm:$0xff]  ;;  %v328_v26 = vpack.c.bf16 %v25_v22, %v24_v21  ;;  %v26_v27 = vld [vmem:[%s504_s1 + $0x50] sm:$0xff]  ;;  %v117_v30 = vld [vmem:[%s506_s2 + $0x40] sm:$0xff] }
   0x8   :  { %347 = vmatpush3.bf16.msra.mxu1 %v344_v15  ;;  %v27_v28 = vld [vmem:[%s504_s1 + $0x58] sm:$0xff]  ;;  %v356_v29 = vpack.c.bf16 %v116_v25, %v115_v24  ;;  %v118_v31 = vld [vmem:[%s506_s2 + $0x48] sm:$0xff]  ;;  %v28_v33 = vld [vmem:[%s504_s1 + $0x60] sm:$0xff] }
   0x9   :  { %319 = vmatpush3.bf16.msra.mxu0 %v316_v5  ;;  %349 = vmatprep.subr.bf16.mxu1 %v348_v17  ;;  %v332_v32 = vpack.c.bf16 %v27_v28, %v26_v27  ;;  %v29_v34 = vld [vmem:[%s504_s1 + $0x68] sm:$0xff]  ;;  %v360_v35 = vpack.c.bf16 %v118_v31, %v117_v30  ;;  %v119_v36 = vld [vmem:[%s506_s2 + $0x50] sm:$0xff]  ;;  %v120_v37 = vld [vmem:[%s506_s2 + $0x58] sm:$0xff] }
   0xa   :  { %321 = vmatprep.subr.bf16.mxu0 %v320_v8  ;;  %v336_v38 = vpack.c.bf16 %v29_v34, %v28_v33  ;;  %v30_v39 = vld [vmem:[%s504_s1 + $0x70] sm:$0xff]  ;;  %v31_v40 = vld [vmem:[%s504_s1 + $0x78] sm:$0xff]  ;;  %v364_v41 = vpack.c.bf16 %v120_v37, %v119_v36  ;;  %v121_v42 = vld [vmem:[%s506_s2 + $0x60] sm:$0xff] }
   0xb   :  { %v122_v43 = vld [vmem:[%s506_s2 + $0x68] sm:$0xff]  ;;  %v340_v44 = vpack.c.bf16 %v31_v40, %v30_v39  ;;  %v123_v47 = vld [vmem:[%s506_s2 + $0x70] sm:$0xff]  ;;  %v124_v48 = vld [vmem:[%s506_s2 + $0x78] sm:$0xff] }
   0xc   :  { %351 = vmatpush3.bf16.msra.mxu1 %v348_v17  ;;  %v368_v45 = vpack.c.bf16 %v122_v43, %v121_v42  ;;  %v15_v46 = vld [vmem:[%s505_s0 + $0x8] sm:$0xff]  ;;  %v372_v49 = vpack.c.bf16 %v124_v48, %v123_v47 }
   0xd   :  { %323 = vmatpush3.bf16.msra.mxu0 %v320_v8  ;;  %353 = vmatprep.subr.bf16.mxu1 %v352_v23 }
   0xe   :  { %325 = vmatprep.subr.bf16.mxu0 %v324_v20 }
  0x10   :  { %355 = vmatpush3.bf16.msra.mxu1 %v352_v23 }
  0x11   :  { %327 = vmatpush3.bf16.msra.mxu0 %v324_v20  ;;  %357 = vmatprep.subr.bf16.mxu1 %v356_v29 }
  0x12   :  { %329 = vmatprep.subr.bf16.mxu0 %v328_v26 }
  0x14   :  { %359 = vmatpush3.bf16.msra.mxu1 %v356_v29 }
  0x15   :  { %331 = vmatpush3.bf16.msra.mxu0 %v328_v26  ;;  %361 = vmatprep.subr.bf16.mxu1 %v360_v35 }
  0x16   :  { %333 = vmatprep.subr.bf16.mxu0 %v332_v32 }
  0x18   :  { %363 = vmatpush3.bf16.msra.mxu1 %v360_v35 }
  0x19   :  { %335 = vmatpush3.bf16.msra.mxu0 %v332_v32  ;;  %365 = vmatprep.subr.bf16.mxu1 %v364_v41 }
  0x1a   :  { %337 = vmatprep.subr.bf16.mxu0 %v336_v38 }
  0x1c   :  { %367 = vmatpush3.bf16.msra.mxu1 %v364_v41 }
  0x1d   :  { %339 = vmatpush3.bf16.msra.mxu0 %v336_v38  ;;  %369 = vmatprep.subr.bf16.mxu1 %v368_v45 }
  0x1e   :  { %341 = vmatprep.subr.bf16.mxu0 %v340_v44 }
  0x20   :  { %371 = vmatpush3.bf16.msra.mxu1 %v368_v45 }
  0x21   :  { %343 = vmatpush3.bf16.msra.mxu0 %v340_v44  ;;  %373 = vmatprep.subr.bf16.mxu1 %v372_v49 }
  0x24   :  { %275 = vmatmul.mubr.f32.vlgmr.msra.gmra.mrb[0].mxu0 %v15_v46  ;;  %375 = vmatpush3.bf16.msra.mxu1 %v372_v49 }
  0xf7   :  { %v276_v50 = vpop.f32.mrb[0].mxu0 }
  0xf8   :  { %v98_v51 = vpop.f32.mrb[1].mxu0  ;;  %v108_v53 = vmax.f32 %v276_v50, 0.0 }
  0xf9   :  { %v107_v52 = vmax.f32 %v98_v51, 0.0 }
  0xfb   :  { %309 = vmatprep.mubr.f32.mxu1 %v107_v52 }
  0xfc   :  { %310 = vmatmul.mubr.f32.vlgmr.msra.gmra.mrb[0].mxu1 %v108_v53 }
 0x1cf   :  { %v311_v54 = vpop.f32.mrb[0].mxu1 }
 0x1d0   :  { %201 = vst [vmem:[%s507_s3 + $0x8] sm:$0xff] %v311_v54  ;;  %v191_v55 = vpop.f32.mrb[1].mxu1 }
 0x1d1   :  { %200 = vst [vmem:[%s507_s3] sm:$0xff] %v191_v55 }

</bundles_post_ra>
